<compile_context>
chip_gen: v6e
topology: v6e:2x2x1
jax: 0.10.0
libtpu: 0.0.40
codegen_flags: <defaults>
</compile_context>

<pallas_src>
import jax
import jax.numpy as jnp
from jax.experimental import pallas as pl
from jax.experimental.pallas import tpu as pltpu


def _cell_kernel(x_ref, nf_ref, adj_ref, w0b_ref, u0w_ref, w1b_ref, o_ref):
    """Single invocation; batch folded into the lane axis.

    x_ref   : (N, B*F)   x with each batch occupying an F-wide lane stripe.
    nf_ref  : (N, F)     node features (batch-invariant).
    adj_ref : (N, N)     adjacency.
    w0b/w1b : (B*F, B*F) block-diagonal kron(I_B, W) -> per-batch feature
                         projection as one lane-wide matmul.
    u0w     : (F, B*F)   U0 tiled along lanes -> node_fts @ u0w is the
                         batch-replicated bias directly in (N, B*F) layout.
    """
    adj = adj_ref[...]
    x = x_ref[...]

    # batch-invariant bias, computed exactly once per call
    nf_bias = jnp.dot(nf_ref[...], u0w_ref[...],
                      preferred_element_type=jnp.float32)          # (N, B*F)

    # mixed op 0 (fixed path): h0 = relu((A @ x) @ W0 + node_fts @ U0)
    ax = jnp.dot(adj, x, preferred_element_type=jnp.float32)        # (N, B*F)
    h0 = jnp.maximum(
        jnp.dot(ax, w0b_ref[...], preferred_element_type=jnp.float32) + nf_bias,
        0.0,
    )

    # mixed op 1 (fixed path): h1 = relu((A @ h0) @ W1)
    ah0 = jnp.dot(adj, h0, preferred_element_type=jnp.float32)      # (N, B*F)
    h1 = jnp.maximum(
        jnp.dot(ah0, w1b_ref[...], preferred_element_type=jnp.float32),
        0.0,
    )

    o_ref[...] = h1.astype(o_ref.dtype)


@jax.jit
def cell_forward(x, node_fts, adj_mats, w0, u0, w1):
    B, N, F = x.shape
    BF = B * F

    # --- layout plumbing (no module compute hoisted out of the kernel) ---
    # fold batch into the lane axis: (B, N, F) -> (N, B*F)
    x_nbf = jnp.transpose(x, (1, 0, 2)).reshape(N, BF)
    eye_b = jnp.eye(B, dtype=jnp.float32)
    w0_blk = jnp.kron(eye_b, w0)            # (B*F, B*F) block-diagonal
    w1_blk = jnp.kron(eye_b, w1)            # (B*F, B*F) block-diagonal
    u0_wide = jnp.tile(u0, (1, B))          # (F, B*F) lane-tiled

    # advisory cost hint for XLA scheduling of the tiny custom call
    flops = 2 * (2 * N * N * BF + 2 * N * BF * BF + N * F * BF)
    bytes_accessed = 4 * (x_nbf.size + node_fts.size + adj_mats.size
                          + w0_blk.size + u0_wide.size + w1_blk.size + N * BF)

    out_nbf = pl.pallas_call(
        _cell_kernel,
        out_shape=jax.ShapeDtypeStruct((N, BF), jnp.float32),
        grid_spec=pltpu.PrefetchScalarGridSpec(
            num_scalar_prefetch=0,
            grid=(1,),
            in_specs=[
                pl.BlockSpec((N, BF), lambda i: (0, 0)),    # x (lane-folded)
                pl.BlockSpec((N, F), lambda i: (0, 0)),     # node_fts
                pl.BlockSpec((N, N), lambda i: (0, 0)),     # adj_mats
                pl.BlockSpec((BF, BF), lambda i: (0, 0)),   # W0 (block-diag)
                pl.BlockSpec((F, BF), lambda i: (0, 0)),    # U0 (lane-tiled)
                pl.BlockSpec((BF, BF), lambda i: (0, 0)),   # W1 (block-diag)
            ],
            out_specs=pl.BlockSpec((N, BF), lambda i: (0, 0)),
        ),
        compiler_params=pltpu.CompilerParams(
            dimension_semantics=("arbitrary",),
        ),
        cost_estimate=pl.CostEstimate(
            flops=flops, transcendentals=0, bytes_accessed=bytes_accessed),
    )(x_nbf, node_fts, adj_mats, w0_blk, u0_wide, w1_blk)

    # unfold lanes back to (B, N, F)
    return jnp.transpose(out_nbf.reshape(N, B, F), (1, 0, 2))


class CellPallas:
    """JAX/Pallas analogue of Cell(num_mixed_ops, filters, num_of_features,
    num_of_vertices) in ONE_PATH_FIXED mode."""

    def __init__(self, num_mixed_ops, filters, num_of_features, num_of_vertices, key):
        assert num_mixed_ops == 2
        self.num_of_features = num_of_features
        self.num_of_vertices = num_of_vertices
        k0, k1, k2 = jax.random.split(key, 3)
        F = num_of_features
        scale = 1.0 / jnp.sqrt(F)
        # deterministic synthetic parameters (no checkpoint loading)
        self.w0 = jax.random.normal(k0, (F, F), jnp.float32) * scale
        self.u0 = jax.random.normal(k1, (F, F), jnp.float32) * scale
        self.w1 = jax.random.normal(k2, (F, F), jnp.float32) * scale

    def __call__(self, x, node_fts, adj_mats):
        return cell_forward(x, node_fts, adj_mats, self.w0, self.u0, self.w1)


if __name__ == "__main__":
    key = jax.random.PRNGKey(0)
    k_x, k_nf, k_adj, k_params = jax.random.split(key, 4)

    B = 2                    # batch
    N = 16                   # num_of_vertices
    F = 32                   # num_of_features
    num_mixed_ops = 2
    filters = [F]

    x = jax.random.normal(k_x, (B, N, F), jnp.float32)
    node_fts = jax.random.normal(k_nf, (N, F), jnp.float32)
    # row-normalized random adjacency
    adj_mats = jax.nn.softmax(
        jax.random.normal(k_adj, (N, N), jnp.float32), axis=-1
    ).astype(jnp.float32)

    cell = CellPallas(num_mixed_ops, filters, F, N, k_params)
    out = jax.block_until_ready(cell(x, node_fts, adj_mats))

    # pure-JAX reference of the same fixed paths
    def ref(x, nf, adj, w0, u0, w1):
        h0 = jax.nn.relu(jnp.einsum("nm,bmf->bnf", adj, x) @ w0 + nf @ u0)
        h1 = jax.nn.relu(jnp.einsum("nm,bmf->bnf", adj, h0) @ w1)
        return h1

    expected = ref(x, node_fts, adj_mats, cell.w0, cell.u0, cell.w1)
    assert out.shape == (B, N, F)
    assert jnp.allclose(out, expected, atol=2e-4, rtol=2e-4)

    print("KERNEL_OK")
</pallas_src>

<mosaic_0001>
module attributes {stable_mosaic.version = 11 : i64} {
  func.func @_cell_kernel(%arg0: i32, %arg1: memref<16x64xf32, #tpu.memory_space<vmem>>, %arg2: memref<16x32xf32, #tpu.memory_space<vmem>>, %arg3: memref<16x16xf32, #tpu.memory_space<vmem>>, %arg4: memref<64x64xf32, #tpu.memory_space<vmem>>, %arg5: memref<32x64xf32, #tpu.memory_space<vmem>>, %arg6: memref<64x64xf32, #tpu.memory_space<vmem>>, %arg7: memref<16x64xf32, #tpu.memory_space<vmem>>) attributes {dimension_semantics = [#tpu.dimension_semantics<arbitrary>], iteration_bounds = array<i64: 1>, scalar_prefetch = 0 : i64, scratch_operands = 0 : i64, tpu.core_type = #tpu.core_type<tc>, window_params = [{pipeline_mode = #tpu.pipeline_mode<synchronous>, transform_indices = @transform_0, window_bounds = array<i64: 16, 64>}, {pipeline_mode = #tpu.pipeline_mode<synchronous>, transform_indices = @transform_1, window_bounds = array<i64: 16, 32>}, {pipeline_mode = #tpu.pipeline_mode<synchronous>, transform_indices = @transform_2, window_bounds = array<i64: 16, 16>}, {pipeline_mode = #tpu.pipeline_mode<synchronous>, transform_indices = @transform_3, window_bounds = array<i64: 64, 64>}, {pipeline_mode = #tpu.pipeline_mode<synchronous>, transform_indices = @transform_4, window_bounds = array<i64: 32, 64>}, {pipeline_mode = #tpu.pipeline_mode<synchronous>, transform_indices = @transform_5, window_bounds = array<i64: 64, 64>}, {pipeline_mode = #tpu.pipeline_mode<synchronous>, transform_indices = @transform_6, window_bounds = array<i64: 16, 64>}]} {
    %c0 = arith.constant 0 : index
    %c0_0 = arith.constant 0 : index
    %0 = vector.load %arg3[%c0, %c0_0] : memref<16x16xf32, #tpu.memory_space<vmem>>, vector<16x16xf32>
    %c0_1 = arith.constant 0 : index
    %c0_2 = arith.constant 0 : index
    %1 = vector.load %arg1[%c0_1, %c0_2] : memref<16x64xf32, #tpu.memory_space<vmem>>, vector<16x64xf32>
    %c0_3 = arith.constant 0 : index
    %c0_4 = arith.constant 0 : index
    %2 = vector.load %arg2[%c0_3, %c0_4] : memref<16x32xf32, #tpu.memory_space<vmem>>, vector<16x32xf32>
    %c0_5 = arith.constant 0 : index
    %c0_6 = arith.constant 0 : index
    %3 = vector.load %arg5[%c0_5, %c0_6] : memref<32x64xf32, #tpu.memory_space<vmem>>, vector<32x64xf32>
    %cst = arith.constant dense<0.000000e+00> : vector<16x64xf32>
    %4 = tpu.matmul %2, %3, %cst {dimension_numbers = #tpu.dot_dimension_numbers<[1], [0], [0], [1], [0, 0, 1, 1], [], []>} : vector<16x32xf32>, vector<32x64xf32>, vector<16x64xf32> -> vector<16x64xf32>
    %cst_7 = arith.constant dense<0.000000e+00> : vector<16x64xf32>
    %5 = tpu.matmul %0, %1, %cst_7 {dimension_numbers = #tpu.dot_dimension_numbers<[1], [0], [0], [1], [0, 0, 1, 1], [], []>} : vector<16x16xf32>, vector<16x64xf32>, vector<16x64xf32> -> vector<16x64xf32>
    %c0_8 = arith.constant 0 : index
    %c0_9 = arith.constant 0 : index
    %6 = vector.load %arg4[%c0_8, %c0_9] : memref<64x64xf32, #tpu.memory_space<vmem>>, vector<64x64xf32>
    %cst_10 = arith.constant dense<0.000000e+00> : vector<16x64xf32>
    %7 = tpu.matmul %5, %6, %cst_10 {dimension_numbers = #tpu.dot_dimension_numbers<[1], [0], [0], [1], [0, 0, 1, 1], [], []>} : vector<16x64xf32>, vector<64x64xf32>, vector<16x64xf32> -> vector<16x64xf32>
    %8 = arith.addf %7, %4 : vector<16x64xf32>
    %cst_11 = arith.constant 0.000000e+00 : f32
    %9 = vector.broadcast %cst_11 : f32 to vector<16x64xf32>
    %10 = arith.maximumf %8, %9 : vector<16x64xf32>
    %cst_12 = arith.constant dense<0.000000e+00> : vector<16x64xf32>
    %11 = tpu.matmul %0, %10, %cst_12 {dimension_numbers = #tpu.dot_dimension_numbers<[1], [0], [0], [1], [0, 0, 1, 1], [], []>} : vector<16x16xf32>, vector<16x64xf32>, vector<16x64xf32> -> vector<16x64xf32>
    %c0_13 = arith.constant 0 : index
    %c0_14 = arith.constant 0 : index
    %12 = vector.load %arg6[%c0_13, %c0_14] : memref<64x64xf32, #tpu.memory_space<vmem>>, vector<64x64xf32>
    %cst_15 = arith.constant dense<0.000000e+00> : vector<16x64xf32>
    %13 = tpu.matmul %11, %12, %cst_15 {dimension_numbers = #tpu.dot_dimension_numbers<[1], [0], [0], [1], [0, 0, 1, 1], [], []>} : vector<16x64xf32>, vector<64x64xf32>, vector<16x64xf32> -> vector<16x64xf32>
    %cst_16 = arith.constant 0.000000e+00 : f32
    %14 = vector.broadcast %cst_16 : f32 to vector<16x64xf32>
    %15 = arith.maximumf %13, %14 : vector<16x64xf32>
    %c0_17 = arith.constant 0 : index
    %c0_18 = arith.constant 0 : index
    %16 = vector.load %arg7[%c0_17, %c0_18] : memref<16x64xf32, #tpu.memory_space<vmem>>, vector<16x64xf32>
    tpu.vector_store %arg7[%c0_17, %c0_18], %15 {strides = array<i32>} : memref<16x64xf32, #tpu.memory_space<vmem>>, vector<16x64xf32>,
    return
  }
  func.func @transform_0(%arg0: i32) -> (i32, i32) {
    %c0_i32 = arith.constant 0 : i32
    %c0_i32_0 = arith.constant 0 : i32
    %c0_i32_1 = arith.constant 0 : i32
    return %c0_i32, %c0_i32_0 : i32, i32
  }
  func.func @transform_1(%arg0: i32) -> (i32, i32) {
    %c0_i32 = arith.constant 0 : i32
    %c0_i32_0 = arith.constant 0 : i32
    %c0_i32_1 = arith.constant 0 : i32
    return %c0_i32, %c0_i32_0 : i32, i32
  }
  func.func @transform_2(%arg0: i32) -> (i32, i32) {
    %c0_i32 = arith.constant 0 : i32
    %c0_i32_0 = arith.constant 0 : i32
    %c0_i32_1 = arith.constant 0 : i32
    return %c0_i32, %c0_i32_0 : i32, i32
  }
  func.func @transform_3(%arg0: i32) -> (i32, i32) {
    %c0_i32 = arith.constant 0 : i32
    %c0_i32_0 = arith.constant 0 : i32
    %c0_i32_1 = arith.constant 0 : i32
    return %c0_i32, %c0_i32_0 : i32, i32
  }
  func.func @transform_4(%arg0: i32) -> (i32, i32) {
    %c0_i32 = arith.constant 0 : i32
    %c0_i32_0 = arith.constant 0 : i32
    %c0_i32_1 = arith.constant 0 : i32
    return %c0_i32, %c0_i32_0 : i32, i32
  }
  func.func @transform_5(%arg0: i32) -> (i32, i32) {
    %c0_i32 = arith.constant 0 : i32
    %c0_i32_0 = arith.constant 0 : i32
    %c0_i32_1 = arith.constant 0 : i32
    return %c0_i32, %c0_i32_0 : i32, i32
  }
  func.func @transform_6(%arg0: i32) -> (i32, i32) {
    %c0_i32 = arith.constant 0 : i32
    %c0_i32_0 = arith.constant 0 : i32
    %c0_i32_1 = arith.constant 0 : i32
    return %c0_i32, %c0_i32_0 : i32, i32
  }
}

</mosaic_0001>

<bundles_post_ra>
// kernel: tile.9
= control target key start
LH: loop header
LB: loop body
LE: loop exit
PB: predicated region body
PF: predicated region fallthrough
CT: control target
= control target key end

     0   :  { %vm163_vm0 = vcmask 1047556   ;;  %s305_s10 = smov 32   ;;  %vm165_vm1 = vcmask 261120   ;;  %vm202_vm2 = vcmask 523520   ;;  %s452_s0 = inlined_call_operand.vmem [shape: f32[32,2,32], index: 0, kind: input, shape index: {}]   ;;  %s453_s1 = inlined_call_operand.vmem [shape: f32[32,64], index: 1, kind: output, shape index: {}]  }
   0x1   :  { %v291_v0 = vld [vmem:[%s452_s0 + $0xe] sm:$0x3]  ;;  %v292_v1 = vld [vmem:[%s452_s0 + $0xc] sm:$0x3]  ;;  %v293_v2 = vld [vmem:[%s452_s0 + $0xa] sm:$0x3] }
   0x2   :  { %129 = vst [vmem:[#allocation0 + $0x38] sm:$0x3] %v291_v0  ;;  %134 = vst [vmem:[#allocation0 + $0x30] sm:$0x3] %v292_v1  ;;  %v294_v3 = vld [vmem:[%s452_s0 + $0x8] sm:$0x3] }
   0x3   :  { %139 = vst [vmem:[#allocation0 + $0x28] sm:$0x3] %v293_v2  ;;  %v295_v4 = vld [vmem:[%s452_s0 + $0x6] sm:$0x3]  ;;  %v296_v5 = vld [vmem:[%s452_s0 + $0x4] sm:$0x3] }
   0x4   :  { %144 = vst [vmem:[#allocation0 + $0x20] sm:$0x3] %v294_v3  ;;  %149 = vst [vmem:[#allocation0 + $0x18] sm:$0x3] %v295_v4  ;;  %v297_v6 = vld [vmem:[%s452_s0 + $0x2] sm:$0x3] }
   0x5   :  { %154 = vst [vmem:[#allocation0 + $0x10] sm:$0x3] %v296_v5  ;;  %v159_v7 = vld [vmem:[%s452_s0] sm:$0x3]  ;;  %158 = vst [vmem:[#allocation0 + $0x8] sm:$0x3] %v297_v6 }
   0x6   :  { %160 = vst [vmem:[#allocation0] sm:$0x3] %v159_v7  ;;  %v275_v8 = vld [vmem:[%s452_s0 + $0x2e] sm:$0x3]  ;;  %v276_v9 = vld [vmem:[%s452_s0 + $0x2c] sm:$0x3] }
   0x7   :  { %v277_v10 = vld [vmem:[%s452_s0 + $0x2a] sm:$0x3]  ;;  %49 = vst [vmem:[#allocation0 + $0xb8] sm:$0x3] %v275_v8  ;;  %54 = vst [vmem:[#allocation0 + $0xb0] sm:$0x3] %v276_v9 }
   0x8   :  { %59 = vst [vmem:[#allocation0 + $0xa8] sm:$0x3] %v277_v10  ;;  %v278_v11 = vld [vmem:[%s452_s0 + $0x28] sm:$0x3]  ;;  %v279_v12 = vld [vmem:[%s452_s0 + $0x26] sm:$0x3] }
   0x9   :  { %v280_v13 = vld [vmem:[%s452_s0 + $0x24] sm:$0x3]  ;;  %64 = vst [vmem:[#allocation0 + $0xa0] sm:$0x3] %v278_v11  ;;  %69 = vst [vmem:[#allocation0 + $0x98] sm:$0x3] %v279_v12 }
   0xa   :  { %74 = vst [vmem:[#allocation0 + $0x90] sm:$0x3] %v280_v13  ;;  %v281_v14 = vld [vmem:[%s452_s0 + $0x22] sm:$0x3]  ;;  %v282_v15 = vld [vmem:[%s452_s0 + $0x20] sm:$0x3] }
   0xb   :  { %v283_v16 = vld [vmem:[%s452_s0 + $0x1e] sm:$0x3]  ;;  %79 = vst [vmem:[#allocation0 + $0x88] sm:$0x3] %v281_v14  ;;  %84 = vst [vmem:[#allocation0 + $0x80] sm:$0x3] %v282_v15 }
   0xc   :  { %89 = vst [vmem:[#allocation0 + $0x78] sm:$0x3] %v283_v16  ;;  %v284_v17 = vld [vmem:[%s452_s0 + $0x1c] sm:$0x3]  ;;  %v285_v18 = vld [vmem:[%s452_s0 + $0x1a] sm:$0x3] }
   0xd   :  { %v286_v19 = vld [vmem:[%s452_s0 + $0x18] sm:$0x3]  ;;  %94 = vst [vmem:[#allocation0 + $0x70] sm:$0x3] %v284_v17  ;;  %99 = vst [vmem:[#allocation0 + $0x68] sm:$0x3] %v285_v18 }
   0xe   :  { %104 = vst [vmem:[#allocation0 + $0x60] sm:$0x3] %v286_v19  ;;  %v287_v20 = vld [vmem:[%s452_s0 + $0x16] sm:$0x3]  ;;  %v288_v21 = vld [vmem:[%s452_s0 + $0x14] sm:$0x3] }
   0xf   :  { %v289_v22 = vld [vmem:[%s452_s0 + $0x12] sm:$0x3]  ;;  %109 = vst [vmem:[#allocation0 + $0x58] sm:$0x3] %v287_v20  ;;  %114 = vst [vmem:[#allocation0 + $0x50] sm:$0x3] %v288_v21 }
  0x10   :  { %119 = vst [vmem:[#allocation0 + $0x48] sm:$0x3] %v289_v22  ;;  %v290_v23 = vld [vmem:[%s452_s0 + $0x10] sm:$0x3]  ;;  %v267_v24 = vld [vmem:[%s452_s0 + $0x3e] sm:$0x3] }
  0x11   :  { %v268_v25 = vld [vmem:[%s452_s0 + $0x3c] sm:$0x3]  ;;  %v197_v26 = vld [vmem:[#allocation0 + $0x1] ss:$8 sm:$0xf0]  }
  0x12   :  { %124 = vst [vmem:[#allocation0 + $0x40] sm:$0x3] %v290_v23  ;;  %9 = vst [vmem:[#allocation0 + $0xf8] sm:$0x3] %v267_v24  ;;  %v269_v27 = vld [vmem:[%s452_s0 + $0x3a] sm:$0x3] }
  0x13   :  { %14 = vst [vmem:[#allocation0 + $0xf0] sm:$0x3] %v268_v25  ;;  %v195_v28 = vld [vmem:[#allocation0 + $0x1] ss:$8 sm:$0xf]  }
  0x14   :  { %19 = vst [vmem:[#allocation0 + $0xe8] sm:$0x3] %v269_v27  ;;  %v270_v29 = vld [vmem:[%s452_s0 + $0x38] sm:$0x3]  ;;  %v199_v30 = vsel %vm163_vm0, %v197_v26, %v195_v28  ;;  %v271_v31 = vld [vmem:[%s452_s0 + $0x36] sm:$0x3] }
  0x15   :  { %24 = vst [vmem:[#allocation0 + $0xe0] sm:$0x3] %v270_v29  ;;  %v272_v32 = vld [vmem:[%s452_s0 + $0x34] sm:$0x3]  ;;  %v273_v33 = vld [vmem:[%s452_s0 + $0x32] sm:$0x3]  ;;  %200 = vrot.lane.b32.xlu0 %v199_v30, %s305_s10 }
  0x16   :  { %v218_v34 = vld [vmem:[#allocation0 + $0x81] ss:$8 sm:$0xf0]   ;;  %29 = vst [vmem:[#allocation0 + $0xd8] sm:$0x3] %v271_v31 }
  0x17   :  { %34 = vst [vmem:[#allocation0 + $0xd0] sm:$0x3] %v272_v32  ;;  %39 = vst [vmem:[#allocation0 + $0xc8] sm:$0x3] %v273_v33  ;;  %v274_v35 = vld [vmem:[%s452_s0 + $0x30] sm:$0x3] }
  0x18   :  { %v216_v36 = vld [vmem:[#allocation0 + $0x81] ss:$8 sm:$0xf]   ;;  %44 = vst [vmem:[#allocation0 + $0xc0] sm:$0x3] %v274_v35 }
  0x19   :  { %v161_v37 = vld [vmem:[#allocation0] ss:$8 sm:$0xf]   ;;  %v220_v38 = vsel %vm163_vm0, %v218_v34, %v216_v36  ;;  %v207_v39 = vld [vmem:[#allocation0 + $0x41] ss:$8 sm:$0xf0]  }
  0x1a   :  { %v162_v40 = vld [vmem:[#allocation0] ss:$8 sm:$0xf0]   ;;  %221 = vrot.lane.b32.xlu1 %v220_v38, %s305_s10  ;;  %v205_v44 = vld [vmem:[#allocation0 + $0x41] ss:$8 sm:$0xf]  }
  0x1b   :  { %v164_v41 = vsel %vm163_vm0, %v162_v40, %v161_v37  ;;  %v177_v42 = vld [vmem:[#allocation0 + $0x80] ss:$8 sm:$0xf]   ;;  %v209_v47 = vsel %vm163_vm0, %v207_v39, %v205_v44 }
  0x1c   :  { %v179_v43 = vld [vmem:[#allocation0 + $0x80] ss:$8 sm:$0xf0]   ;;  %166 = vst.msk [vmem:[%s453_s1] sm:$0xff] %vm165_vm1, %v164_v41   ;;  %210 = vrot.lane.b32.xlu0 %v209_v47, %s305_s10 }
  0x1d   :  { %v181_v45 = vsel %vm163_vm0, %v179_v43, %v177_v42  ;;  %v168_v46 = vld [vmem:[#allocation0 + $0x40] ss:$8 sm:$0xf]   ;;  %v229_v49 = vld [vmem:[#allocation0 + $0xc1] ss:$8 sm:$0xf0]  }
  0x1e   :  { %299 = vst.msk [vmem:[%s453_s1 + $0x10] sm:$0xff] %vm165_vm1, %v181_v45   ;;  %v170_v48 = vld [vmem:[#allocation0 + $0x40] ss:$8 sm:$0xf0]  }
  0x1f   :  { %v172_v50 = vsel %vm163_vm0, %v170_v48, %v168_v46  ;;  %v188_v51 = vld [vmem:[#allocation0 + $0xc0] ss:$8 sm:$0xf0]   ;;  %v227_v52 = vld [vmem:[#allocation0 + $0xc1] ss:$8 sm:$0xf]  }
  0x20   :  { %298 = vst.msk [vmem:[%s453_s1 + $0x8] sm:$0xff] %vm165_vm1, %v172_v50   ;;  %v186_v53 = vld [vmem:[#allocation0 + $0xc0] ss:$8 sm:$0xf]   ;;  %v231_v54 = vsel %vm163_vm0, %v229_v49, %v227_v52 }
  0x21   :  { %v190_v55 = vsel %vm163_vm0, %v188_v51, %v186_v53  ;;  %232 = vrot.lane.b32.xlu1 %v231_v54, %s305_s10 }
  0x22   :  { %300 = vst.msk [vmem:[%s453_s1 + $0x18] sm:$0xff] %vm165_vm1, %v190_v55  }
  0x87   :  { %v201_v56 = vpop.permute.xlu0 %200  }
  0x88   :  { %203 = vst.msk [vmem:[%s453_s1] sm:$0xff] %vm202_vm2, %v201_v56  }
  0x8c   :  { %v222_v57 = vpop.permute.xlu1 %221  }
  0x8d   :  { %302 = vst.msk [vmem:[%s453_s1 + $0x10] sm:$0xff] %vm202_vm2, %v222_v57  }
  0x8e   :  { %v211_v58 = vpop.permute.xlu0 %210  }
  0x8f   :  { %301 = vst.msk [vmem:[%s453_s1 + $0x8] sm:$0xff] %vm202_vm2, %v211_v58  }
  0x93   :  { %v233_v59 = vpop.permute.xlu1 %232  }
  0x94   :  { %303 = vst.msk [vmem:[%s453_s1 + $0x18] sm:$0xff] %vm202_vm2, %v233_v59  }

// kernel: cell_forward.1
= control target key start
LH: loop header
LB: loop body
LE: loop exit
PB: predicated region body
PF: predicated region fallthrough
CT: control target
= control target key end

     0   :  { %vm115_vm0 = vcmask 130048   ;;  %vm33_vm1 = vcmask 261120   ;;  %vm205_vm2 = vcmask 523264   ;;  %s701_s0 = inlined_call_operand.vmem [shape: f32[16,64], index: 0, kind: input, shape index: {}]   ;;  %s702_s2 = inlined_call_operand.vmem [shape: f32[16,16], index: 2, kind: input, shape index: {}]   ;;  %s703_s3 = inlined_call_operand.vmem [shape: f32[64,64], index: 3, kind: input, shape index: {}]   ;;  %s704_s4 = inlined_call_operand.vmem [shape: f32[32,64], index: 4, kind: input, shape index: {}]   ;;  %s705_s1 = inlined_call_operand.vmem [shape: f32[16,32], index: 1, kind: input, shape index: {}]   ;;  %s706_s5 = inlined_call_operand.vmem [shape: f32[64,64], index: 5, kind: input, shape index: {}]   ;;  %s707_s6 = inlined_call_operand.vmem [shape: f32[16,64], index: 6, kind: output, shape index: {}]  }
   0x1   :  { %v26_v0 = vld [vmem:[%s701_s0 + $0x8] sm:$0xff]  ;;  %v25_v1 = vld [vmem:[%s701_s0] sm:$0xff]  ;;  %v204_v4 = vld [vmem:[%s703_s3 + $0x38] sm:$0xff] }
   0x2   :  { %v23_v2 = vld [vmem:[%s702_s2] sm:$0xff]  ;;  %516 = vmatprep.subr.mxu1 %v26_v0  ;;  %v616_v3 = vld [vmem:[%s702_s2 + $0x8] sm:$0xff]  ;;  %v32_v5 = vld [vmem:[%s704_s4 + $0x18] sm:$0xff] }
   0x3   :  { %520 = vmatprep.mubr.msk.f32.mxu1 %vm115_vm0, %v23_v2  ;;  %517 = vmatpush3.msra.mxu1 %v26_v0  ;;  %v31_v6 = vld [vmem:[%s704_s4 + $0x10] sm:$0xff]  ;;  %v30_v8 = vld [vmem:[%s704_s4 + $0x8] sm:$0xff]  ;;  %v29_v10 = vld [vmem:[%s704_s4] sm:$0xff] }
   0x4   :  { %518 = vmatprep.subr.mxu1 %v25_v1  ;;  %505 = vmatprep.subr.mxu0 %v32_v5  ;;  %v203_v7 = vld [vmem:[%s703_s3 + $0x30] sm:$0xff]  ;;  %v202_v9 = vld [vmem:[%s703_s3 + $0x28] sm:$0xff]  ;;  %v201_v11 = vld [vmem:[%s703_s3 + $0x20] sm:$0xff] }
   0x5   :  { %519 = vmatpush3.msra.mxu1 %v25_v1  ;;  %506 = vmatpush3.msra.mxu0 %v32_v5  ;;  %v200_v12 = vld [vmem:[%s703_s3 + $0x18] sm:$0xff]  ;;  %v199_v13 = vld [vmem:[%s703_s3 + $0x10] sm:$0xff]  ;;  %v198_v14 = vld [vmem:[%s703_s3 + $0x8] sm:$0xff] }
   0x6   :  { %521 = vmatmul.mubr.msk.f32.vlgmr.msra.gmra.mxu1 %vm115_vm0, %v616_v3  ;;  %523 = vmatprep.subr.mxu1 %v204_v4  ;;  %v27_v15 = vld [vmem:[%s705_s1] sm:$0xff]  ;;  %v28_v16 = vld [vmem:[%s705_s1 + $0x8] sm:$0xff]  ;;  %v371_v20 = vld [vmem:[%s706_s5 + $0x38] sm:$0xff] }
   0x7   :  { %524 = vmatpush3.msra.mxu1 %v204_v4  ;;  %507 = vmatprep.subr.mxu0 %v31_v6  ;;  %v197_v17 = vld [vmem:[%s703_s3] sm:$0xff]  ;;  %v370_v21 = vld [vmem:[%s706_s5 + $0x30] sm:$0xff]  ;;  %v369_v22 = vld [vmem:[%s706_s5 + $0x28] sm:$0xff] }
   0x8   :  { %525 = vmatprep.subr.mxu1 %v203_v7  ;;  %508 = vmatpush3.msra.mxu0 %v31_v6  ;;  %v368_v23 = vld [vmem:[%s706_s5 + $0x20] sm:$0xff]  ;;  %v367_v24 = vld [vmem:[%s706_s5 + $0x18] sm:$0xff]  ;;  %v366_v25 = vld [vmem:[%s706_s5 + $0x10] sm:$0xff] }
   0x9   :  { %526 = vmatpush3.msra.mxu1 %v203_v7  ;;  %509 = vmatprep.subr.mxu0 %v30_v8  ;;  %v365_v34 = vld [vmem:[%s706_s5 + $0x8] sm:$0xff]  ;;  %v364_v35 = vld [vmem:[%s706_s5] sm:$0xff] }
   0xa   :  { %527 = vmatprep.subr.mxu1 %v202_v9  ;;  %510 = vmatpush3.msra.mxu0 %v30_v8 }
   0xb   :  { %528 = vmatpush3.msra.mxu1 %v202_v9  ;;  %511 = vmatprep.subr.mxu0 %v29_v10 }
   0xc   :  { %529 = vmatprep.subr.mxu1 %v201_v11  ;;  %512 = vmatpush3.msra.mxu0 %v29_v10 }
   0xd   :  { %530 = vmatpush3.msra.mxu1 %v201_v11  ;;  %513 = vmatprep.mubr.msk.f32.mxu0 %vm33_vm1, %v27_v15 }
   0xe   :  { %531 = vmatprep.subr.mxu1 %v200_v12  ;;  %514 = vmatmul.mubr.msk.f32.vlgmr.msra.gmra.mxu0 %vm33_vm1, %v28_v16 }
   0xf   :  { %532 = vmatpush3.msra.mxu1 %v200_v12  ;;  %549 = vmatprep.subr.mxu0 %v371_v20 }
  0x10   :  { %533 = vmatprep.subr.mxu1 %v199_v13  ;;  %550 = vmatpush3.msra.mxu0 %v371_v20 }
  0x11   :  { %534 = vmatpush3.msra.mxu1 %v199_v13  ;;  %551 = vmatprep.subr.mxu0 %v370_v21 }
  0x12   :  { %535 = vmatprep.subr.mxu1 %v198_v14  ;;  %552 = vmatpush3.msra.mxu0 %v370_v21 }
  0x13   :  { %536 = vmatpush3.msra.mxu1 %v198_v14  ;;  %553 = vmatprep.subr.mxu0 %v369_v22 }
  0x14   :  { %537 = vmatprep.subr.mxu1 %v197_v17  ;;  %554 = vmatpush3.msra.mxu0 %v369_v22 }
  0x15   :  { %538 = vmatpush3.msra.mxu1 %v197_v17  ;;  %555 = vmatprep.subr.mxu0 %v368_v23 }
  0x16   :  { %556 = vmatpush3.msra.mxu0 %v368_v23 }
  0x17   :  { %557 = vmatprep.subr.mxu0 %v367_v24 }
  0x18   :  { %558 = vmatpush3.msra.mxu0 %v367_v24 }
  0x19   :  { %559 = vmatprep.subr.mxu0 %v366_v25 }
  0x1a   :  { %560 = vmatpush3.msra.mxu0 %v366_v25 }
  0x1b   :  { %561 = vmatprep.subr.mxu0 %v365_v34 }
  0x1c   :  { %562 = vmatpush3.msra.mxu0 %v365_v34 }
  0x1d   :  { %563 = vmatprep.subr.mxu0 %v364_v35 }
  0x1e   :  { %564 = vmatpush3.msra.mxu0 %v364_v35 }
  0xc6   :  { %v522_v18 = vpop.f32.mrf.mxu1 }
  0xc8   :  { %v188_v19 = vpop.f32.mrf.mxu1 }
  0xc9   :  { %539 = vmatprep.mubr.msk.f32.mxu1 %vm205_vm2, %v188_v19 }
  0xca   :  { %540 = vmatmul.mubr.msk.f32.vlgmr.msra.gmra.mxu1 %vm205_vm2, %v522_v18 }
  0xcb   :  { %546 = vmatprep.mubr.msk.f32.mxu1 %vm115_vm0, %v23_v2 }
  0xce   :  { %v515_v26 = vpop.f32.mrf.mxu0 }
  0xd0   :  { %v106_v29 = vpop.f32.mrf.mxu0 }
 0x18a   :  { %v541_v27 = vpop.f32.mrf.mxu1 }
 0x18b   :  { %v284_v28 = vadd.f32 %v541_v27, %v515_v26 }
 0x18c   :  { %v278_v30 = vpop.f32.mrf.mxu1 }
 0x18d   :  { %v288_v31 = vmax.f32 %v284_v28, 0.0  ;;  %v279_v32 = vadd.f32 %v278_v30, %v106_v29 }
 0x18f   :  { %v287_v33 = vmax.f32 %v279_v32, 0.0  ;;  %542 = vmatprep.subr.mxu1 %v288_v31 }
 0x190   :  { %543 = vmatpush3.msra.mxu1 %v288_v31 }
 0x191   :  { %544 = vmatprep.subr.mxu1 %v287_v33 }
 0x192   :  { %545 = vmatpush3.msra.mxu1 %v287_v33 }
 0x193   :  { %547 = vmatmul.mubr.msk.f32.vlgmr.msra.gmra.mxu1 %vm115_vm0, %v616_v3 }
 0x253   :  { %v548_v36 = vpop.f32.mrf.mxu1 }
 0x255   :  { %v355_v37 = vpop.f32.mrf.mxu1 }
 0x256   :  { %565 = vmatprep.mubr.msk.f32.mxu0 %vm205_vm2, %v355_v37 }
 0x257   :  { %566 = vmatmul.mubr.msk.f32.vlgmr.msra.gmra.mxu0 %vm205_vm2, %v548_v36 }
 0x317   :  { %v567_v38 = vpop.f32.mrf.mxu0 }
 0x318   :  { %v454_v39 = vmax.f32 %v567_v38, 0.0 }
 0x319   :  { %v444_v40 = vpop.f32.mrf.mxu0 }
 0x31a   :  { %456 = vst.msk [vmem:[%s707_s6 + $0x8] sm:$0xff] %vm205_vm2, %v454_v39  ;;  %v453_v41 = vmax.f32 %v444_v40, 0.0 }
 0x31c   :  { %455 = vst.msk [vmem:[%s707_s6] sm:$0xff] %vm205_vm2, %v453_v41 }

</bundles_post_ra>
